<compile_context>
chip_gen: v7x
topology: tpu7x:2x2x1
jax: 0.10.0
libtpu: 0.0.40
codegen_flags: <defaults>
</compile_context>

<pallas_src>
import jax
import jax.numpy as jnp
import numpy as np
from jax import lax
from jax.experimental import pallas as pl
from jax.experimental.pallas import tpu as pltpu


# ----------------------------------------------------------------------------
# Fused kernel: concat (virtual) + 1x1 conv + folded BN + PReLU.
#   x1_ref, x2_ref : (B*C, hw_tile)   batch folded onto sublanes
#   w_ref          : (Co, 2C)         BN-folded 1x1 conv weights
#   b_ref          : (Co, 1)          BN-folded bias
#   alpha_ref      : (1,) in SMEM     PReLU slope
#   o_ref          : (B*Co, hw_tile)
# ----------------------------------------------------------------------------
def _concat_conv_bn_prelu_kernel(x1_ref, x2_ref, w_ref, b_ref, alpha_ref, o_ref):
    w = w_ref[...]                        # (Co, 2C)
    Co, twoC = w.shape
    C = twoC // 2
    BC, hw = x1_ref.shape
    B = BC // C

    alpha = alpha_ref[0]                  # PReLU slope (scalar, SMEM)
    bias_b = jnp.broadcast_to(b_ref[...], (Co, hw)).astype(jnp.float32)  # hoisted

    for b in range(B):                    # static unroll over batch (B small)
        x1 = x1_ref[b * C:(b + 1) * C, :]  # (C, hw)  static slice, zero cost
        x2 = x2_ref[b * C:(b + 1) * C, :]  # (C, hw)

        # torch.cat([x1, x2], dim=1): first C weight columns hit x1's channels,
        # the next C hit x2's.  K = 2C is tiny -> VPU outer-product FMAs, not
        # a tiny (under-utilized) MXU matmul.  Two independent chains.
        acc1 = bias_b
        for i in range(C):
            acc1 = acc1 + w[:, i:i + 1] * x1[i:i + 1, :]

        acc2 = w[:, C:C + 1] * x2[0:1, :]
        for i in range(1, C):
            acc2 = acc2 + w[:, C + i:C + i + 1] * x2[i:i + 1, :]

        acc = acc1 + acc2
        o_ref[b * Co:(b + 1) * Co, :] = jnp.where(acc >= 0.0, acc, alpha * acc)


# ----------------------------------------------------------------------------
# Parameters (deterministic, synthetic).
# ----------------------------------------------------------------------------
def init_params(key, ch_in, ch_out):
    c2i = 2 * ch_in
    ks = jax.random.split(key, 6)
    return dict(
        conv_w=0.1 * jax.random.normal(ks[0], (ch_out, c2i), jnp.float32),
        conv_b=0.1 * jax.random.normal(ks[1], (ch_out,), jnp.float32),
        bn_gamma=1.0 + 0.1 * jax.random.normal(ks[2], (ch_out,), jnp.float32),
        bn_beta=0.1 * jax.random.normal(ks[3], (ch_out,), jnp.float32),
        bn_mean=0.1 * jax.random.normal(ks[4], (ch_out,), jnp.float32),
        bn_var=jax.random.uniform(ks[5], (ch_out,), jnp.float32, 0.5, 1.5),
        prelu_a=jnp.float32(0.25),        # nn.PReLU() default (num_parameters=1)
    )


def _parallel_spatial_tiles():
    """2 lane-tiles on multi-TensorCore chips (v7x), 1 on single-TC chips."""
    try:
        kind = jax.devices()[0].device_kind.lower()
    except Exception:
        return 1
    return 2 if "v7" in kind else 1


# ----------------------------------------------------------------------------
# Wrapper: fold BN into the 1x1 conv, set up lane-dense blocks, call Pallas.
# ----------------------------------------------------------------------------
def concat_forward(x1, x2, params, bn_eps=1e-5):
    B, C, H, W = x1.shape
    HW = H * W
    Co = params["conv_w"].shape[0]

    # Fold Conv2d bias + BatchNorm into the 1x1 conv weights.
    # TODO(synk): BatchNorm2d reproduced in eval/inference mode (running
    # stats); training-mode batch statistics are not implemented.
    scale = params["bn_gamma"] / jnp.sqrt(params["bn_var"] + bn_eps)
    shift = params["bn_beta"] - params["bn_mean"] * scale
    w_eff = (scale[:, None] * params["conv_w"]).astype(jnp.float32)          # (Co, 2C)
    b_eff = (params["conv_b"] * scale + shift)[:, None].astype(jnp.float32)  # (Co, 1)
    alpha = jnp.asarray(params["prelu_a"], jnp.float32).reshape(1)           # (1,)

    # Contiguous reshape (free): fold batch onto sublanes, spatial onto lanes.
    x1f = x1.reshape(B * C, HW)
    x2f = x2.reshape(B * C, HW)

    # Single grid step on single-TC chips (v5e/v6e); 2-way 128-lane spatial
    # split on a parallel axis for v7x's two TensorCores.
    hw_tiles = _parallel_spatial_tiles()
    if HW % (128 * hw_tiles) != 0:
        hw_tiles = 1
    hw_tile = HW // hw_tiles

    flops = 2 * B * Co * (2 * C) * HW + 3 * B * Co * HW
    bytes_accessed = 4 * (2 * B * C * HW + Co * 2 * C + Co + B * Co * HW)

    out = pl.pallas_call(
        _concat_conv_bn_prelu_kernel,
        grid=(hw_tiles,),
        in_specs=[
            pl.BlockSpec((B * C, hw_tile), lambda t: (0, t)),
            pl.BlockSpec((B * C, hw_tile), lambda t: (0, t)),
            pl.BlockSpec((Co, 2 * C), lambda t: (0, 0)),
            pl.BlockSpec((Co, 1), lambda t: (0, 0)),
            pl.BlockSpec(memory_space=pltpu.MemorySpace.SMEM),
        ],
        out_specs=pl.BlockSpec((B * Co, hw_tile), lambda t: (0, t)),
        out_shape=jax.ShapeDtypeStruct((B * Co, HW), jnp.float32),
        compiler_params=pltpu.CompilerParams(
            dimension_semantics=("parallel",)),
        cost_estimate=pl.CostEstimate(flops=flops, transcendentals=0,
                                      bytes_accessed=bytes_accessed),
    )(x1f, x2f, w_eff, b_eff, alpha)

    return out.reshape(B, Co, H, W)


# ----------------------------------------------------------------------------
# Pure-JAX reference mirroring the torch forward (for validation).
# ----------------------------------------------------------------------------
def reference(x1, x2, params, bn_eps=1e-5):
    x = jnp.concatenate([x1, x2], axis=1)                       # (B, 2C, H, W)
    z = jnp.einsum("oi,bihw->bohw", params["conv_w"], x,
                   precision=lax.Precision.HIGHEST)
    z = z + params["conv_b"][None, :, None, None]
    scale = params["bn_gamma"] / jnp.sqrt(params["bn_var"] + bn_eps)
    shift = params["bn_beta"] - params["bn_mean"] * scale
    z = z * scale[None, :, None, None] + shift[None, :, None, None]
    return jnp.where(z >= 0, z, params["prelu_a"] * z)


if __name__ == "__main__":
    B, C_in, C_out, H, W = 2, 4, 8, 16, 16
    key = jax.random.PRNGKey(0)
    k1, k2, kp = jax.random.split(key, 3)
    x1 = jax.random.normal(k1, (B, C_in, H, W), jnp.float32)
    x2 = jax.random.normal(k2, (B, C_in, H, W), jnp.float32)
    params = init_params(kp, C_in, C_out)

    out = concat_forward(x1, x2, params)
    jax.block_until_ready(out)

    ref = reference(x1, x2, params)
    assert out.shape == (B, C_out, H, W)
    np.testing.assert_allclose(np.asarray(out), np.asarray(ref),
                               rtol=1e-4, atol=1e-5)
    print("KERNEL_OK")
</pallas_src>

<mosaic_0001>
module attributes {stable_mosaic.version = 11 : i64} {
  func.func @_concat_conv_bn_prelu_kernel(%arg0: i32, %arg1: memref<8x256xf32, #tpu.memory_space<vmem>>, %arg2: memref<8x256xf32, #tpu.memory_space<vmem>>, %arg3: memref<8x8xf32, #tpu.memory_space<vmem>>, %arg4: memref<8x1xf32, #tpu.memory_space<vmem>>, %arg5: memref<1xf32, #tpu.memory_space<smem>>, %arg6: memref<16x256xf32, #tpu.memory_space<vmem>>) attributes {dimension_semantics = [#tpu.dimension_semantics<parallel>], iteration_bounds = array<i64: 1>, scalar_prefetch = 0 : i64, scratch_operands = 0 : i64, tpu.core_type = #tpu.core_type<tc>, window_params = [{transform_indices = @transform_0, window_bounds = array<i64: 8, 256>}, {transform_indices = @transform_1, window_bounds = array<i64: 8, 256>}, {pipeline_mode = #tpu.pipeline_mode<synchronous>, transform_indices = @transform_2, window_bounds = array<i64: 8, 8>}, {pipeline_mode = #tpu.pipeline_mode<synchronous>, transform_indices = @transform_3, window_bounds = array<i64: 8, 1>}, {transform_indices = @transform_4, window_bounds = array<i64: 1>}, {transform_indices = @transform_5, window_bounds = array<i64: 16, 256>}]} {
    %c0 = arith.constant 0 : index
    %c0_0 = arith.constant 0 : index
    %0 = vector.load %arg3[%c0, %c0_0] : memref<8x8xf32, #tpu.memory_space<vmem>>, vector<8x8xf32>
    %c0_1 = arith.constant 0 : index
    %1 = memref.load %arg5[%c0_1] : memref<1xf32, #tpu.memory_space<smem>>
    %c0_2 = arith.constant 0 : index
    %c0_3 = arith.constant 0 : index
    %2 = vector.load %arg4[%c0_2, %c0_3] : memref<8x1xf32, #tpu.memory_space<vmem>>, vector<8x1xf32>
    %3 = vector.shape_cast %2 : vector<8x1xf32> to vector<8x1xf32>
    %4 = vector.broadcast %3 : vector<8x1xf32> to vector<8x256xf32>
    %c0_4 = arith.constant 0 : index
    %c0_5 = arith.constant 0 : index
    %5 = vector.load %arg1[%c0_4, %c0_5] : memref<8x256xf32, #tpu.memory_space<vmem>>, vector<4x256xf32>
    %c0_6 = arith.constant 0 : index
    %c0_7 = arith.constant 0 : index
    %6 = vector.load %arg2[%c0_6, %c0_7] : memref<8x256xf32, #tpu.memory_space<vmem>>, vector<4x256xf32>
    %7 = vector.extract_strided_slice %0 {offsets = [0, 0], sizes = [8, 1], strides = [1, 1]} : vector<8x8xf32> to vector<8x1xf32>
    %8 = vector.extract_strided_slice %5 {offsets = [0, 0], sizes = [1, 256], strides = [1, 1]} : vector<4x256xf32> to vector<1x256xf32>
    %9 = vector.broadcast %7 : vector<8x1xf32> to vector<8x256xf32>
    %10 = vector.broadcast %8 : vector<1x256xf32> to vector<8x256xf32>
    %11 = arith.mulf %9, %10 : vector<8x256xf32>
    %12 = arith.addf %4, %11 : vector<8x256xf32>
    %13 = vector.extract_strided_slice %0 {offsets = [0, 1], sizes = [8, 1], strides = [1, 1]} : vector<8x8xf32> to vector<8x1xf32>
    %14 = vector.extract_strided_slice %5 {offsets = [1, 0], sizes = [1, 256], strides = [1, 1]} : vector<4x256xf32> to vector<1x256xf32>
    %15 = vector.broadcast %13 : vector<8x1xf32> to vector<8x256xf32>
    %16 = vector.broadcast %14 : vector<1x256xf32> to vector<8x256xf32>
    %17 = arith.mulf %15, %16 : vector<8x256xf32>
    %18 = arith.addf %12, %17 : vector<8x256xf32>
    %19 = vector.extract_strided_slice %0 {offsets = [0, 2], sizes = [8, 1], strides = [1, 1]} : vector<8x8xf32> to vector<8x1xf32>
    %20 = vector.extract_strided_slice %5 {offsets = [2, 0], sizes = [1, 256], strides = [1, 1]} : vector<4x256xf32> to vector<1x256xf32>
    %21 = vector.broadcast %19 : vector<8x1xf32> to vector<8x256xf32>
    %22 = vector.broadcast %20 : vector<1x256xf32> to vector<8x256xf32>
    %23 = arith.mulf %21, %22 : vector<8x256xf32>
    %24 = arith.addf %18, %23 : vector<8x256xf32>
    %25 = vector.extract_strided_slice %0 {offsets = [0, 3], sizes = [8, 1], strides = [1, 1]} : vector<8x8xf32> to vector<8x1xf32>
    %26 = vector.extract_strided_slice %5 {offsets = [3, 0], sizes = [1, 256], strides = [1, 1]} : vector<4x256xf32> to vector<1x256xf32>
    %27 = vector.broadcast %25 : vector<8x1xf32> to vector<8x256xf32>
    %28 = vector.broadcast %26 : vector<1x256xf32> to vector<8x256xf32>
    %29 = arith.mulf %27, %28 : vector<8x256xf32>
    %30 = arith.addf %24, %29 : vector<8x256xf32>
    %31 = vector.extract_strided_slice %0 {offsets = [0, 4], sizes = [8, 1], strides = [1, 1]} : vector<8x8xf32> to vector<8x1xf32>
    %32 = vector.extract_strided_slice %6 {offsets = [0, 0], sizes = [1, 256], strides = [1, 1]} : vector<4x256xf32> to vector<1x256xf32>
    %33 = vector.broadcast %31 : vector<8x1xf32> to vector<8x256xf32>
    %34 = vector.broadcast %32 : vector<1x256xf32> to vector<8x256xf32>
    %35 = arith.mulf %33, %34 : vector<8x256xf32>
    %36 = vector.extract_strided_slice %0 {offsets = [0, 5], sizes = [8, 1], strides = [1, 1]} : vector<8x8xf32> to vector<8x1xf32>
    %37 = vector.extract_strided_slice %6 {offsets = [1, 0], sizes = [1, 256], strides = [1, 1]} : vector<4x256xf32> to vector<1x256xf32>
    %38 = vector.broadcast %36 : vector<8x1xf32> to vector<8x256xf32>
    %39 = vector.broadcast %37 : vector<1x256xf32> to vector<8x256xf32>
    %40 = arith.mulf %38, %39 : vector<8x256xf32>
    %41 = arith.addf %35, %40 : vector<8x256xf32>
    %42 = vector.extract_strided_slice %0 {offsets = [0, 6], sizes = [8, 1], strides = [1, 1]} : vector<8x8xf32> to vector<8x1xf32>
    %43 = vector.extract_strided_slice %6 {offsets = [2, 0], sizes = [1, 256], strides = [1, 1]} : vector<4x256xf32> to vector<1x256xf32>
    %44 = vector.broadcast %42 : vector<8x1xf32> to vector<8x256xf32>
    %45 = vector.broadcast %43 : vector<1x256xf32> to vector<8x256xf32>
    %46 = arith.mulf %44, %45 : vector<8x256xf32>
    %47 = arith.addf %41, %46 : vector<8x256xf32>
    %48 = vector.extract_strided_slice %0 {offsets = [0, 7], sizes = [8, 1], strides = [1, 1]} : vector<8x8xf32> to vector<8x1xf32>
    %49 = vector.extract_strided_slice %6 {offsets = [3, 0], sizes = [1, 256], strides = [1, 1]} : vector<4x256xf32> to vector<1x256xf32>
    %50 = vector.broadcast %48 : vector<8x1xf32> to vector<8x256xf32>
    %51 = vector.broadcast %49 : vector<1x256xf32> to vector<8x256xf32>
    %52 = arith.mulf %50, %51 : vector<8x256xf32>
    %53 = arith.addf %47, %52 : vector<8x256xf32>
    %54 = arith.addf %30, %53 : vector<8x256xf32>
    %cst = arith.constant 0.000000e+00 : f32
    %55 = vector.broadcast %cst : f32 to vector<8x256xf32>
    %56 = arith.cmpf oge, %54, %55 : vector<8x256xf32>
    %57 = vector.broadcast %1 : f32 to vector<8x256xf32>
    %58 = arith.mulf %57, %54 : vector<8x256xf32>
    %59 = arith.select %56, %54, %58 : vector<8x256xi1>, vector<8x256xf32>
    %c0_8 = arith.constant 0 : index
    %c0_9 = arith.constant 0 : index
    %60 = vector.load %arg6[%c0_8, %c0_9] : memref<16x256xf32, #tpu.memory_space<vmem>>, vector<8x256xf32>
    tpu.vector_store %arg6[%c0_8, %c0_9], %59 {strides = array<i32>} : memref<16x256xf32, #tpu.memory_space<vmem>>, vector<8x256xf32>,
    %c4 = arith.constant 4 : index
    %c0_10 = arith.constant 0 : index
    %61 = vector.load %arg1[%c4, %c0_10] : memref<8x256xf32, #tpu.memory_space<vmem>>, vector<4x256xf32>
    %c4_11 = arith.constant 4 : index
    %c0_12 = arith.constant 0 : index
    %62 = vector.load %arg2[%c4_11, %c0_12] : memref<8x256xf32, #tpu.memory_space<vmem>>, vector<4x256xf32>
    %63 = vector.extract_strided_slice %0 {offsets = [0, 0], sizes = [8, 1], strides = [1, 1]} : vector<8x8xf32> to vector<8x1xf32>
    %64 = vector.extract_strided_slice %61 {offsets = [0, 0], sizes = [1, 256], strides = [1, 1]} : vector<4x256xf32> to vector<1x256xf32>
    %65 = vector.broadcast %63 : vector<8x1xf32> to vector<8x256xf32>
    %66 = vector.broadcast %64 : vector<1x256xf32> to vector<8x256xf32>
    %67 = arith.mulf %65, %66 : vector<8x256xf32>
    %68 = arith.addf %4, %67 : vector<8x256xf32>
    %69 = vector.extract_strided_slice %0 {offsets = [0, 1], sizes = [8, 1], strides = [1, 1]} : vector<8x8xf32> to vector<8x1xf32>
    %70 = vector.extract_strided_slice %61 {offsets = [1, 0], sizes = [1, 256], strides = [1, 1]} : vector<4x256xf32> to vector<1x256xf32>
    %71 = vector.broadcast %69 : vector<8x1xf32> to vector<8x256xf32>
    %72 = vector.broadcast %70 : vector<1x256xf32> to vector<8x256xf32>
    %73 = arith.mulf %71, %72 : vector<8x256xf32>
    %74 = arith.addf %68, %73 : vector<8x256xf32>
    %75 = vector.extract_strided_slice %0 {offsets = [0, 2], sizes = [8, 1], strides = [1, 1]} : vector<8x8xf32> to vector<8x1xf32>
    %76 = vector.extract_strided_slice %61 {offsets = [2, 0], sizes = [1, 256], strides = [1, 1]} : vector<4x256xf32> to vector<1x256xf32>
    %77 = vector.broadcast %75 : vector<8x1xf32> to vector<8x256xf32>
    %78 = vector.broadcast %76 : vector<1x256xf32> to vector<8x256xf32>
    %79 = arith.mulf %77, %78 : vector<8x256xf32>
    %80 = arith.addf %74, %79 : vector<8x256xf32>
    %81 = vector.extract_strided_slice %0 {offsets = [0, 3], sizes = [8, 1], strides = [1, 1]} : vector<8x8xf32> to vector<8x1xf32>
    %82 = vector.extract_strided_slice %61 {offsets = [3, 0], sizes = [1, 256], strides = [1, 1]} : vector<4x256xf32> to vector<1x256xf32>
    %83 = vector.broadcast %81 : vector<8x1xf32> to vector<8x256xf32>
    %84 = vector.broadcast %82 : vector<1x256xf32> to vector<8x256xf32>
    %85 = arith.mulf %83, %84 : vector<8x256xf32>
    %86 = arith.addf %80, %85 : vector<8x256xf32>
    %87 = vector.extract_strided_slice %0 {offsets = [0, 4], sizes = [8, 1], strides = [1, 1]} : vector<8x8xf32> to vector<8x1xf32>
    %88 = vector.extract_strided_slice %62 {offsets = [0, 0], sizes = [1, 256], strides = [1, 1]} : vector<4x256xf32> to vector<1x256xf32>
    %89 = vector.broadcast %87 : vector<8x1xf32> to vector<8x256xf32>
    %90 = vector.broadcast %88 : vector<1x256xf32> to vector<8x256xf32>
    %91 = arith.mulf %89, %90 : vector<8x256xf32>
    %92 = vector.extract_strided_slice %0 {offsets = [0, 5], sizes = [8, 1], strides = [1, 1]} : vector<8x8xf32> to vector<8x1xf32>
    %93 = vector.extract_strided_slice %62 {offsets = [1, 0], sizes = [1, 256], strides = [1, 1]} : vector<4x256xf32> to vector<1x256xf32>
    %94 = vector.broadcast %92 : vector<8x1xf32> to vector<8x256xf32>
    %95 = vector.broadcast %93 : vector<1x256xf32> to vector<8x256xf32>
    %96 = arith.mulf %94, %95 : vector<8x256xf32>
    %97 = arith.addf %91, %96 : vector<8x256xf32>
    %98 = vector.extract_strided_slice %0 {offsets = [0, 6], sizes = [8, 1], strides = [1, 1]} : vector<8x8xf32> to vector<8x1xf32>
    %99 = vector.extract_strided_slice %62 {offsets = [2, 0], sizes = [1, 256], strides = [1, 1]} : vector<4x256xf32> to vector<1x256xf32>
    %100 = vector.broadcast %98 : vector<8x1xf32> to vector<8x256xf32>
    %101 = vector.broadcast %99 : vector<1x256xf32> to vector<8x256xf32>
    %102 = arith.mulf %100, %101 : vector<8x256xf32>
    %103 = arith.addf %97, %102 : vector<8x256xf32>
    %104 = vector.extract_strided_slice %0 {offsets = [0, 7], sizes = [8, 1], strides = [1, 1]} : vector<8x8xf32> to vector<8x1xf32>
    %105 = vector.extract_strided_slice %62 {offsets = [3, 0], sizes = [1, 256], strides = [1, 1]} : vector<4x256xf32> to vector<1x256xf32>
    %106 = vector.broadcast %104 : vector<8x1xf32> to vector<8x256xf32>
    %107 = vector.broadcast %105 : vector<1x256xf32> to vector<8x256xf32>
    %108 = arith.mulf %106, %107 : vector<8x256xf32>
    %109 = arith.addf %103, %108 : vector<8x256xf32>
    %110 = arith.addf %86, %109 : vector<8x256xf32>
    %cst_13 = arith.constant 0.000000e+00 : f32
    %111 = vector.broadcast %cst_13 : f32 to vector<8x256xf32>
    %112 = arith.cmpf oge, %110, %111 : vector<8x256xf32>
    %113 = vector.broadcast %1 : f32 to vector<8x256xf32>
    %114 = arith.mulf %113, %110 : vector<8x256xf32>
    %115 = arith.select %112, %110, %114 : vector<8x256xi1>, vector<8x256xf32>
    %c8 = arith.constant 8 : index
    %c0_14 = arith.constant 0 : index
    %116 = vector.load %arg6[%c8, %c0_14] : memref<16x256xf32, #tpu.memory_space<vmem>>, vector<8x256xf32>
    tpu.vector_store %arg6[%c8, %c0_14], %115 {strides = array<i32>} : memref<16x256xf32, #tpu.memory_space<vmem>>, vector<8x256xf32>,
    return
  }
  func.func @transform_0(%arg0: i32) -> (i32, i32) {
    %c0_i32 = arith.constant 0 : i32
    %c0_i32_0 = arith.constant 0 : i32
    return %c0_i32, %arg0 : i32, i32
  }
  func.func @transform_1(%arg0: i32) -> (i32, i32) {
    %c0_i32 = arith.constant 0 : i32
    %c0_i32_0 = arith.constant 0 : i32
    return %c0_i32, %arg0 : i32, i32
  }
  func.func @transform_2(%arg0: i32) -> (i32, i32) {
    %c0_i32 = arith.constant 0 : i32
    %c0_i32_0 = arith.constant 0 : i32
    %c0_i32_1 = arith.constant 0 : i32
    return %c0_i32, %c0_i32_0 : i32, i32
  }
  func.func @transform_3(%arg0: i32) -> (i32, i32) {
    %c0_i32 = arith.constant 0 : i32
    %c0_i32_0 = arith.constant 0 : i32
    %c0_i32_1 = arith.constant 0 : i32
    return %c0_i32, %c0_i32_0 : i32, i32
  }
  func.func @transform_4(%arg0: i32) -> i32 {
    %c0_i32 = arith.constant 0 : i32
    %c0_i32_0 = arith.constant 0 : i32
    return %c0_i32 : i32
  }
  func.func @transform_5(%arg0: i32) -> (i32, i32) {
    %c0_i32 = arith.constant 0 : i32
    %c0_i32_0 = arith.constant 0 : i32
    return %c0_i32, %arg0 : i32, i32
  }
}

</mosaic_0001>

<bundles_post_ra>
// kernel: tpu_custom_call.1
= control target key start
LH: loop header
LB: loop body
LE: loop exit
PB: predicated region body
PF: predicated region fallthrough
CT: control target
= control target key end

     0   :  { %11 = vsyncpa [#allocation4], 0  ;;  %s609_s0 = inlined_call_operand.hbm [shape: f32[8,256], index: 0, kind: input, shape index: {}]   ;;  %s610_s1 = inlined_call_operand.vmem [shape: f32[8,256], index: 1, kind: input, shape index: {}]   ;;  %s611_s2 = inlined_call_operand.hbm [shape: f32[8,8], index: 2, kind: input, shape index: {}]   ;;  %s612_s3 = inlined_call_operand.vmem [shape: f32[8,1], index: 3, kind: input, shape index: {}]   ;;  %s613_s4 = inlined_call_operand.<no memory space> [shape: f32[1], index: 4, kind: input, shape index: {}]   ;;  %s614_s5 = inlined_call_operand.hbm [shape: f32[16,256], index: 5, kind: output, shape index: {}]  }
   0x1   :  { %12 = vsyncpa [#allocation7], 0 }
   0x2   :  { %13 = vsyncpa [#allocation5], 0  ;;  %s416_s18 = smov [#allocation3]   ;;  %s417_s20 = smov [#allocation6]  }
   0x3   :  { %s20_s19 = sshll.u32 %s416_s18, 4  ;;  %s32_s21 = sshll.u32 %s417_s20, 4  ;;  %s21_s19 = int_to_ptr.vmem [resolvable:$true] %s20_s19  ;;  %s33_s21 = int_to_ptr.vmem [resolvable:$true] %s32_s21 }
   0x4   :  { %s344_s24 = scalar_lea.hbm %s609_s0, 256 }
   0x5   :  { %p345_p0 = scmp.ne.s32.totalorder %s609_s0, %s344_s24  ;;  %p348_p1 = scmp.lt.u32.totalorder %s344_s24, %s609_s0 }
   0x7   :  { %p350_p2 = pnand %p348_p1, %p345_p0 }
   0x9   :  { %353 = shalt.err (!%p350_p2)
}
   0xa   :  { %s354_s29 = scalar_lea.vmem %s21_s19, 256  ;;  %p359_p4 = scmp.lt.s32.totalorder %s21_s19, %s21_s19 }
   0xb   :  { %p355_p3 = scmp.ne.s32.totalorder %s21_s19, %s354_s29  ;;  %p360_p5 = scmp.lt.s32.totalorder %s354_s29, %s354_s29 }
   0xd   :  { %p361_p6 = por %p360_p5, %p359_p4 }
   0xf   :  { %p362_p7 = pnand %p361_p6, %p355_p3 }
  0x11   :  { %365 = shalt.err (!%p362_p7)
}
  0x12   :  { %23 = dma.hbm_to_vmem [thread:$0]  %s609_s0, 256, %s21_s19, [#allocation4]  }
  0x13   :  { %s366_s9 = scalar_lea.hbm %s611_s2, 128 }
  0x14   :  { %p367_p8 = scmp.ne.s32.totalorder %s611_s2, %s366_s9  ;;  %p370_p9 = scmp.lt.u32.totalorder %s366_s9, %s611_s2 }
  0x16   :  { %p372_p10 = pnand %p370_p9, %p367_p8 }
  0x18   :  { %375 = shalt.err (!%p372_p10)
}
  0x19   :  { %s376_s14 = scalar_lea.vmem %s33_s21, 128  ;;  %p381_p12 = scmp.lt.s32.totalorder %s33_s21, %s33_s21 }
  0x1a   :  { %p377_p11 = scmp.ne.s32.totalorder %s33_s21, %s376_s14  ;;  %p382_p13 = scmp.lt.s32.totalorder %s376_s14, %s376_s14 }
  0x1c   :  { %p383_p0 = por %p382_p13, %p381_p12 }
  0x1e   :  { %p384_p1 = pnand %p383_p0, %p377_p11 }
  0x20   :  { %387 = shalt.err (!%p384_p1)
}
  0x21   :  { %35 = dma.hbm_to_vmem [thread:$0]  %s611_s2, 128, %s33_s21, [#allocation7]  }
  0x22   :  { %410 = dma.done.wait [#allocation4], 256  }
  0x23   :  { %411 = vsyncadd [#allocation4], 4294967040 }
  0x24   :  { %412 = dma.done.wait [#allocation7], 128  }
  0x25   :  { %413 = vsyncadd [#allocation7], 4294967168  ;;  %v418_v0 = vmov 1   ;;  %v419_v1 = vmov 0   ;;  %v46_v2 = vld [vmem:[#allocation6] sm:$0xff]  ;;  %v48_v3 = vld [vmem:[%s612_s3] sm:$0xff]  ;;  %v63_v10 = vlaneseq }
  0x26   :  { %336 = vset.pattern.permute.xlu1 %v418_v0  ;;  %335 = vset.pattern.permute.xlu0 %v419_v1  ;;  %v420_v4 = vmov 4   ;;  %v421_v5 = vmov 5   ;;  %v422_v6 = vmov 2   ;;  %v423_v7 = vmov 3   ;;  %v492_v15 = vld [vmem:[#allocation3] sm:$0xf] }
  0x27   :  { %76 = vperm.xlu1 %336, %v46_v2   ;;  %60 = vperm.xlu0 %335, %v46_v2   ;;  %v424_v8 = vmov 6   ;;  %v425_v9 = vmov 7   ;;  %v64_v11 = vshrl.u32 %v63_v10, 7  ;;  %v494_v16 = vld [vmem:[#allocation3 + $0x8] sm:$0xf]  ;;  %s426_s25 = smov [#allocation8]  }
  0x28   :  { %v496_v17 = vld [vmem:[#allocation3] sm:$0xf0]  ;;  %v498_v18 = vld [vmem:[#allocation3 + $0x8] sm:$0xf0]  ;;  %v505_v20 = vld [vmem:[%s610_s1] sm:$0xf] }
  0x29   :  { %v486_v12 = vsub.s32 1, %v64_v11  ;;  %v488_v13 = vsub.s32 5, %v64_v11  ;;  %v490_v14 = vsub.s32 0, %v64_v11  ;;  %v500_v19 = vsub.s32 4, %v64_v11  ;;  %v510_v21 = vld [vmem:[%s610_s1 + $0x8] sm:$0xf] }
  0x2a   :  { %v523_v28 = vld [vmem:[%s610_s1] sm:$0xf0]  ;;  %v528_v29 = vld [vmem:[%s610_s1 + $0x8] sm:$0xf0]  ;;  %v534_v32 = vsub.s32 2, %v64_v11  ;;  %v536_v33 = vsub.s32 6, %v64_v11 }
  0x2b   :  { %337 = vset.pattern.permute.xlu1 %v420_v4  ;;  %51 = vperm.xlu0 %335, %v48_v3   ;;  %v82_v22 = vrot.slane %v492_v15, %v486_v12  ;;  %v86_v23 = vrot.slane %v494_v16, %v486_v12  ;;  %v215_v24 = vrot.slane %v496_v17, %v488_v13  ;;  %v550_v40 = vsub.s32 3, %v64_v11  ;;  %s309_s26 = sshll.u32 %s426_s25, 4  ;;  %s310_s26 = int_to_ptr.vmem [resolvable:$true] %s309_s26 }
  0x2c   :  { %124 = vperm.xlu1 %337, %v46_v2   ;;  %v66_v26 = vrot.slane %v492_v15, %v490_v14  ;;  %v219_v30 = vrot.slane %v498_v18, %v488_v13  ;;  %v70_v31 = vrot.slane %v494_v16, %v490_v14  ;;  %v203_v34 = vrot.slane %v496_v17, %v500_v19  ;;  %p393_p3 = scmp.lt.s32.totalorder %s310_s26, %s310_s26 }
  0x2d   :  { %v207_v35 = vrot.slane %v498_v18, %v500_v19  ;;  %v130_v36 = vrot.slane %v505_v20, %v490_v14  ;;  %v134_v37 = vrot.slane %v510_v21, %v490_v14  ;;  %v251_v38 = vrot.slane %v523_v28, %v500_v19 }
  0x2e   :  { %v255_v39 = vrot.slane %v528_v29, %v500_v19  ;;  %v552_v41 = vsub.s32 7, %v64_v11  ;;  %v144_v43 = vrot.slane %v505_v20, %v486_v12  ;;  %v148_v44 = vrot.slane %v510_v21, %v486_v12 }
  0x2f   :  { %338 = vset.pattern.permute.xlu0 %v421_v5  ;;  %v261_v45 = vrot.slane %v523_v28, %v488_v13  ;;  %v265_v46 = vrot.slane %v528_v29, %v488_v13  ;;  %v98_v48 = vrot.slane %v492_v15, %v534_v32  ;;  %v102_v49 = vrot.slane %v494_v16, %v534_v32 }
  0x30   :  { %339 = vset.pattern.permute.xlu1 %v422_v6  ;;  %138 = vperm.xlu0 %338, %v46_v2   ;;  %v227_v50 = vrot.slane %v496_v17, %v536_v33  ;;  %v231_v51 = vrot.slane %v498_v18, %v536_v33  ;;  %v114_v56 = vrot.slane %v492_v15, %v550_v40 }
  0x31   :  { %92 = vperm.xlu1 %339, %v46_v2   ;;  %v118_v57 = vrot.slane %v494_v16, %v550_v40  ;;  %v239_v58 = vrot.slane %v496_v17, %v552_v41  ;;  %v243_v59 = vrot.slane %v498_v18, %v552_v41  ;;  %v160_v60 = vrot.slane %v505_v20, %v534_v32 }
  0x32   :  { %v164_v61 = vrot.slane %v510_v21, %v534_v32  ;;  %v273_v62 = vrot.slane %v523_v28, %v536_v33  ;;  %v277_v63 = vrot.slane %v528_v29, %v536_v33  ;;  %v176_v1 = vrot.slane %v505_v20, %v550_v40 }
  0x33   :  { %v285_v3 = vrot.slane %v523_v28, %v552_v41  ;;  %v289_v4 = vrot.slane %v528_v29, %v552_v41 }
  0x34   :  { %341 = vset.pattern.permute.xlu0 %v423_v7 }
  0x35   :  { %340 = vset.pattern.permute.xlu1 %v424_v8  ;;  %108 = vperm.xlu0 %341, %v46_v2  }
  0x36   :  { %154 = vperm.xlu1 %340, %v46_v2  }
  0x39   :  { %343 = vset.pattern.permute.xlu0 %v425_v9 }
  0x3a   :  { %342 = vset.pattern.permute.xlu1 %v425_v9 }
  0x3b   :  { %170 = vperm.xlu1 %342, %v46_v2   ;;  %v180_v2 = vrot.slane %v510_v21, %v550_v40 }
  0xa6   :  { %v77_v25 = vpop.permute.xlu1 %76  ;;  %v61_v27 = vpop.permute.xlu0 %60 }
  0xa7   :  { %v71_v52 = vmul.f32 %v66_v26, %v61_v27  ;;  %v72_v53 = vmul.f32 %v70_v31, %v61_v27  ;;  %v208_v54 = vmul.f32 %v203_v34, %v61_v27  ;;  %v209_v55 = vmul.f32 %v207_v35, %v61_v27 }
  0xa8   :  { %v87_v10 = vmul.f32 %v82_v22, %v77_v25  ;;  %v88_v11 = vmul.f32 %v86_v23, %v77_v25  ;;  %v220_v12 = vmul.f32 %v215_v24, %v77_v25  ;;  %v221_v13 = vmul.f32 %v219_v30, %v77_v25 }
  0xaa   :  { %v52_v42 = vpop.permute.xlu0 %51 }
  0xab   :  { %v125_v47 = vpop.permute.xlu1 %124  ;;  %v73_v5 = vadd.f32 %v71_v52, %v52_v42  ;;  %v74_v6 = vadd.f32 %v72_v53, %v52_v42  ;;  %v210_v7 = vadd.f32 %v208_v54, %v52_v42  ;;  %v211_v8 = vadd.f32 %v209_v55, %v52_v42 }
  0xac   :  { %v135_v14 = vmul.f32 %v130_v36, %v125_v47  ;;  %v136_v15 = vmul.f32 %v134_v37, %v125_v47  ;;  %v256_v16 = vmul.f32 %v251_v38, %v125_v47  ;;  %v257_v17 = vmul.f32 %v255_v39, %v125_v47 }
  0xad   :  { %v89_v26 = vadd.f32 %v87_v10, %v73_v5  ;;  %v90_v27 = vadd.f32 %v88_v11, %v74_v6  ;;  %v222_v28 = vadd.f32 %v220_v12, %v210_v7  ;;  %v223_v29 = vadd.f32 %v221_v13, %v211_v8 }
  0xae   :  { %v189_v5 = vstv %s613_s4  ;;  %s388_s4 = scalar_lea.vmem %s310_s26, 512 }
  0xaf   :  { %v139_v0 = vpop.permute.xlu0 %138  ;;  %p389_p2 = scmp.ne.s32.totalorder %s310_s26, %s388_s4  ;;  %p394_p4 = scmp.lt.s32.totalorder %s388_s4, %s388_s4 }
  0xb0   :  { %v93_v9 = vpop.permute.xlu1 %92  ;;  %v149_v18 = vmul.f32 %v144_v43, %v139_v0  ;;  %v150_v19 = vmul.f32 %v148_v44, %v139_v0  ;;  %v266_v20 = vmul.f32 %v261_v45, %v139_v0  ;;  %v267_v21 = vmul.f32 %v265_v46, %v139_v0 }
  0xb1   :  { %v103_v31 = vmul.f32 %v98_v48, %v93_v9  ;;  %v104_v32 = vmul.f32 %v102_v49, %v93_v9  ;;  %v232_v33 = vmul.f32 %v227_v50, %v93_v9  ;;  %v233_v34 = vmul.f32 %v231_v51, %v93_v9  ;;  %p395_p5 = por %p394_p4, %p393_p3 }
  0xb2   :  { %v151_v36 = vadd.f32 %v149_v18, %v135_v14  ;;  %v152_v37 = vadd.f32 %v150_v19, %v136_v15  ;;  %v268_v38 = vadd.f32 %v266_v20, %v256_v16  ;;  %v269_v39 = vadd.f32 %v267_v21, %v257_v17 }
  0xb3   :  { %v105_v44 = vadd.f32 %v103_v31, %v89_v26  ;;  %v106_v45 = vadd.f32 %v104_v32, %v90_v27  ;;  %v234_v46 = vadd.f32 %v232_v33, %v222_v28  ;;  %v235_v47 = vadd.f32 %v233_v34, %v223_v29  ;;  %p396_p6 = pnand %p395_p5, %p389_p2 }
  0xb4   :  { %v109_v22 = vpop.permute.xlu0 %108 }
  0xb5   :  { %v155_v23 = vpop.permute.xlu1 %154  ;;  %v119_v40 = vmul.f32 %v114_v56, %v109_v22  ;;  %v120_v41 = vmul.f32 %v118_v57, %v109_v22  ;;  %v244_v42 = vmul.f32 %v239_v58, %v109_v22  ;;  %v245_v43 = vmul.f32 %v243_v59, %v109_v22 }
  0xb6   :  { %v165_v24 = vmul.f32 %v160_v60, %v155_v23  ;;  %v166_v25 = vmul.f32 %v164_v61, %v155_v23  ;;  %v278_v30 = vmul.f32 %v273_v62, %v155_v23  ;;  %v279_v35 = vmul.f32 %v277_v63, %v155_v23 }
  0xb7   :  { %v121_v61 = vadd.f32 %v119_v40, %v105_v44  ;;  %v122_v62 = vadd.f32 %v120_v41, %v106_v45  ;;  %v246_v63 = vadd.f32 %v244_v42, %v234_v46  ;;  %v247_v56 = vadd.f32 %v245_v43, %v235_v47 }
  0xb8   :  { %v167_v49 = vadd.f32 %v165_v24, %v151_v36  ;;  %v168_v50 = vadd.f32 %v166_v25, %v152_v37  ;;  %v280_v51 = vadd.f32 %v278_v30, %v268_v38  ;;  %v281_v52 = vadd.f32 %v279_v35, %v269_v39 }
  0xba   :  { %v171_v48 = vpop.permute.xlu1 %170 }
  0xbb   :  { %v181_v53 = vmul.f32 %v176_v1, %v171_v48  ;;  %v182_v54 = vmul.f32 %v180_v2, %v171_v48  ;;  %v290_v55 = vmul.f32 %v285_v3, %v171_v48  ;;  %v291_v60 = vmul.f32 %v289_v4, %v171_v48 }
  0xbd   :  { %v183_v57 = vadd.f32 %v181_v53, %v167_v49  ;;  %v184_v58 = vadd.f32 %v182_v54, %v168_v50  ;;  %v292_v59 = vadd.f32 %v290_v55, %v280_v51  ;;  %v293_v0 = vadd.f32 %v291_v60, %v281_v52 }
  0xbf   :  { %v185_v6 = vadd.f32 %v183_v57, %v121_v61  ;;  %v186_v7 = vadd.f32 %v184_v58, %v122_v62  ;;  %v294_v8 = vadd.f32 %v292_v59, %v246_v63  ;;  %v295_v9 = vadd.f32 %v293_v0, %v247_v56 }
  0xc1   :  { %vm187_vm0 = vcmp.ge.f32.partialorder %v185_v6, 0.0  ;;  %vm188_vm1 = vcmp.ge.f32.partialorder %v186_v7, 0.0  ;;  %v190_v1 = vmul.f32 %v189_v5, %v185_v6  ;;  %v191_v2 = vmul.f32 %v189_v5, %v186_v7 }
  0xc2   :  { %vm296_vm2 = vcmp.ge.f32.partialorder %v294_v8, 0.0  ;;  %vm297_vm3 = vcmp.ge.f32.partialorder %v295_v9, 0.0  ;;  %v298_v3 = vmul.f32 %v294_v8, %v189_v5  ;;  %v299_v4 = vmul.f32 %v295_v9, %v189_v5 }
  0xc3   :  { %v192_v10 = vsel %vm187_vm0, %v185_v6, %v190_v1  ;;  %v193_v11 = vsel %vm188_vm1, %v186_v7, %v191_v2 }
  0xc4   :  { %194 = vst [vmem:[#allocation8] sm:$0xff] %v192_v10  ;;  %195 = vst [vmem:[#allocation8 + $0x8] sm:$0xff] %v193_v11  ;;  %v300_v12 = vsel %vm296_vm2, %v294_v8, %v298_v3  ;;  %v301_v13 = vsel %vm297_vm3, %v295_v9, %v299_v4 }
  0xc5   :  { %302 = vst [vmem:[#allocation8 + $0x10] sm:$0xff] %v300_v12  ;;  %303 = vst [vmem:[#allocation8 + $0x18] sm:$0xff] %v301_v13 }
  0xc6   :  { %399 = shalt.err (!%p396_p6)
}
  0xc7   :  { %s400_s29 = scalar_lea.hbm %s614_s5, 512 }
  0xc8   :  { %p401_p7 = scmp.ne.s32.totalorder %s614_s5, %s400_s29  ;;  %p404_p8 = scmp.lt.u32.totalorder %s400_s29, %s614_s5 }
  0xca   :  { %p406_p9 = pnand %p404_p8, %p401_p7 }
  0xcc   :  { %409 = shalt.err (!%p406_p9)
}
  0xcd   :  { %s427_s9 = smov 256   ;;  %s428_s10 = smov 16  }
  0xce   :  { %315 = dma.vmem_to_hbm [thread:$0]  %s310_s26, 512, %s614_s5, [#allocation5], %s427_s9, %s427_s9, %s428_s10  }
  0xcf   :  { %414 = dma.done.wait [#allocation5], 512  }
  0xd0   :  { %415 = vsyncadd [#allocation5], 4294966784 }
  0xd1   :  { %319 = vsyncpa [#allocation4], 1 }
  0xd2   :  { %320 = vsyncpa [#allocation7], 1 }
  0xd3   :  { %321 = vsyncpa [#allocation5], 1 }

</bundles_post_ra>
